<compile_context>
chip_gen: v5e
topology: v5e:2x2
jax: 0.10.0
libtpu: 0.0.40
codegen_flags: <defaults>
</compile_context>

<pallas_src>
import math

import jax
import jax.numpy as jnp
from jax import lax
from jax.experimental import pallas as pl
from jax.experimental.pallas import tpu as pltpu


def _vq_kernel(x_ref, cb_ref, cbt_ref, csq_ref, codes_ref, idx_ref):
    x = x_ref[...]          # (D, TN)  f32, D on sublanes, TN on lanes
    cb = cb_ref[...]        # (K, D)   f32
    cbt = cbt_ref[...]      # (D, K)   f32
    c_sq = csq_ref[...]     # (K, 1)   f32

    k = cb.shape[0]

    # distances^T (K, TN): argmin_k ||x - c_k||^2 == argmin_k (||c_k||^2 - 2 c_k.x);
    # the per-column ||x||^2 constant is dropped (argmin-invariant).
    xc_t = jnp.dot(cb, x, preferred_element_type=jnp.float32)      # (K, TN)  MXU
    dist_t = c_sq - 2.0 * xc_t                                     # (K, TN)  VPU

    # Nearest codebook entry: argmin over the codebook axis (axis 0 = sublanes),
    # first index on ties (same tie-break as torch.min / jnp.argmin).  Spelled
    # as min + select so it lowers to plain sublane min-reductions.
    row_ids = lax.broadcasted_iota(jnp.int32, dist_t.shape, 0)     # (K, TN)
    d_min = jnp.min(dist_t, axis=0, keepdims=True)                 # (1, TN)
    idx = jnp.min(jnp.where(dist_t == d_min, row_ids, k),
                  axis=0, keepdims=True)                           # (1, TN) int32

    # Gather codebook rows with a one-hot matmul, already in (K, TN) layout:
    # codes^T (D, TN) = cb^T (D, K) @ one_hot (K, TN)
    one_hot = (row_ids == idx).astype(jnp.float32)                 # (K, TN)
    codes_t = jnp.dot(cbt, one_hot, preferred_element_type=jnp.float32)

    codes_ref[...] = codes_t.astype(codes_ref.dtype)
    idx_ref[...] = idx


def _round_up(a, m):
    return (a + m - 1) // m * m


def vq_channel_major(x3, codebook, *, max_tile=16384):
    """x3: (Bflat, D, HW) channel-major view.  Returns
    (codes (Bflat, D, HW) in codebook dtype, indices (Bflat, 1, HW) int32)."""
    bflat, d, hw = x3.shape
    k, d2 = codebook.shape
    assert d == d2
    out_dtype = codebook.dtype

    # one f32 cast in the wrapper; all in-kernel VPU math stays f32 (v5e note)
    x3 = x3.astype(jnp.float32)
    cb = codebook.astype(jnp.float32)              # (K, D)
    cbt = cb.T                                     # (D, K)
    c_sq = jnp.sum(cb * cb, axis=-1)[:, None]      # (K, 1), hoisted out of kernel

    # ----- generation-aware VMEM budget -----
    try:
        vmem_cap = int(pltpu.get_tpu_info().vmem_capacity_bytes)
    except Exception:
        vmem_cap = 64 << 20                        # conservative: v7x per-TC VMEM
    vmem_budget = min(vmem_cap * 3 // 4, 100 << 20)  # ~48 MiB v7x, ~96 MiB v5e/v6e

    # ----- padding-aware tile derivation (lane->128, sublane->8) -----
    kp = _round_up(k, 8)      # K sits on sublanes in the (K, TN) intermediates
    dp = _round_up(d, 8)      # D sits on sublanes in the x / codes tiles
    # grid-invariant codebook blocks (single copy, padded):
    cb_vmem = 4 * (kp * _round_up(d, 128)          # cb   (K, D)
                   + dp * _round_up(k, 128)        # cb^T (D, K)
                   + kp * 128)                     # ||c||^2 (K, 1)
    # single-buffer the codebook blocks when they are big enough to matter
    # (constant index_map -> a second pipeline buffer is pure VMEM waste)
    single_buffer_consts = cb_vmem > (1 << 20)
    const_bytes = cb_vmem * (1 if single_buffer_consts else 2)
    # f32 bytes per lane-column of a tile: double-buffered x/codes/idx tiles
    # plus the (K, TN)-shaped xc/dist/iota/one-hot/select temporaries.
    per_col = 4 * (2 * dp + 2 * dp + 2 * 8 + 6 * kp)
    headroom = 4 << 20
    tile = (vmem_budget - const_bytes - headroom) // per_col
    tile = max(128, min(tile, max_tile)) // 128 * 128
    # TODO(synk): for very large codebooks (K*TN intermediates > budget), chunk
    # K inside the kernel (running min/argmin + per-chunk one-hot gather)
    # instead of shrinking tile_hw to 128.

    hw_pad = _round_up(hw, 128)
    tile = min(tile, hw_pad)

    # v7x: keep >= ~4-6 total grid steps (>= 2-3 per TensorCore) when possible
    # so each core still has an i+1 block to prefetch.
    target_steps = 6
    max_steps_possible = bflat * (hw_pad // 128)
    eff_target = min(target_steps, max_steps_possible)
    if eff_target > bflat:
        tiles_per_b = pl.cdiv(eff_target, bflat)
        step_cap = max(128, hw_pad // tiles_per_b // 128 * 128)
        tile = min(tile, step_cap)

    hw_pad = _round_up(hw, tile)
    if hw_pad != hw:
        x3 = jnp.pad(x3, ((0, 0), (0, 0), (0, hw_pad - hw)))
    grid = (bflat, hw_pad // tile)

    def _const_spec(shape):
        if single_buffer_consts:
            return pl.BlockSpec(shape, lambda b, j: (0, 0),
                                pipeline_mode=pl.Buffered(1))
        return pl.BlockSpec(shape, lambda b, j: (0, 0))

    codes3, idx3 = pl.pallas_call(
        _vq_kernel,
        out_shape=(
            jax.ShapeDtypeStruct((bflat, d, hw_pad), out_dtype),
            jax.ShapeDtypeStruct((bflat, 1, hw_pad), jnp.int32),
        ),
        grid_spec=pltpu.PrefetchScalarGridSpec(
            num_scalar_prefetch=0,
            grid=grid,
            in_specs=[
                # x tile: D on sublanes, HW on lanes (lane-dense)
                pl.BlockSpec((pl.Squeezed(), d, tile), lambda b, j: (b, 0, j)),
                _const_spec((k, d)),     # codebook        (K, D)
                _const_spec((d, k)),     # codebook^T      (D, K)
                _const_spec((k, 1)),     # ||c||^2 column  (K, 1)
            ],
            out_specs=(
                pl.BlockSpec((pl.Squeezed(), d, tile), lambda b, j: (b, 0, j)),
                pl.BlockSpec((pl.Squeezed(), 1, tile), lambda b, j: (b, 0, j)),
            ),
        ),
        compiler_params=pltpu.CompilerParams(
            dimension_semantics=("parallel", "parallel"),
            vmem_limit_bytes=int(vmem_budget)),
    )(x3, cb, cbt, c_sq)

    return codes3[:, :, :hw], idx3[:, :, :hw]


def vq_forward(x, codebook, dim=1):
    """Mirrors VectorQuantization.forward (dim=1, the value quantize() passes).

    Channel-major: x is reshaped (not transposed) to (lead, D, trail) so the
    kernel sees D on sublanes and the spatial axis on lanes; outputs reshape
    straight back to x's layout."""
    ndim = x.ndim
    dim = dim % ndim
    shape = x.shape
    d = shape[dim]
    lead = math.prod(shape[:dim])
    trail = math.prod(shape[dim + 1:])
    x3 = x.reshape(lead, d, trail)       # pure view for the NCHW / dim=1 case

    codes3, idx3 = vq_channel_major(x3, codebook)

    codes = codes3.reshape(shape)
    indices = idx3.reshape(shape[:dim] + (1,) + shape[dim + 1:])
    return codes, indices
    # TODO(synk): PyTorch returns int64 indices; int32 is used here (no x64).


def make_codebook(key, num_tokens, latent_dim):
    # nn.init.xavier_uniform_ on a (num_tokens, latent_dim) weight:
    # bound = sqrt(6 / (fan_in + fan_out)) = sqrt(6 / (latent_dim + num_tokens))
    bound = (6.0 / (latent_dim + num_tokens)) ** 0.5
    return jax.random.uniform(key, (num_tokens, latent_dim),
                              minval=-bound, maxval=bound, dtype=jnp.float32)


if __name__ == "__main__":
    latent_dim = 4
    num_tokens = 64

    key = jax.random.PRNGKey(0)
    k_x, k_w = jax.random.split(key)
    x = jax.random.normal(k_x, (2, latent_dim, 16, 16), dtype=jnp.float32)
    codebook = make_codebook(k_w, num_tokens, latent_dim)

    codes, indices = jax.jit(vq_forward)(x, codebook)
    jax.block_until_ready((codes, indices))

    # pure-JAX reference check (exact squared distances, per spatial position)
    x_hwlast = jnp.moveaxis(x, 1, -1)                       # (B, H, W, C)
    x_flat = x_hwlast.reshape(-1, latent_dim)
    dist_ref = jnp.sum((x_flat[:, None, :] - codebook[None, :, :]) ** 2, axis=-1)
    idx_flat = jnp.argmin(dist_ref, axis=-1)
    codes_ref = jnp.moveaxis(codebook[idx_flat].reshape(x_hwlast.shape), -1, 1)
    idx_ref = idx_flat.reshape(2, 16, 16)[:, None, :, :]    # (B, 1, H, W)

    assert codes.shape == (2, latent_dim, 16, 16)
    assert indices.shape == (2, 1, 16, 16)
    assert jnp.array_equal(indices, idx_ref.astype(indices.dtype))
    assert jnp.allclose(codes, codes_ref, atol=1e-6)

    print("KERNEL_OK")
</pallas_src>

<mosaic_0001>
module attributes {stable_mosaic.version = 11 : i64} {
  func.func @_vq_kernel(%arg0: i32, %arg1: i32, %arg2: memref<1x4x128xf32, #tpu.memory_space<vmem>>, %arg3: memref<64x4xf32, #tpu.memory_space<vmem>>, %arg4: memref<4x64xf32, #tpu.memory_space<vmem>>, %arg5: memref<64x1xf32, #tpu.memory_space<vmem>>, %arg6: memref<1x4x128xf32, #tpu.memory_space<vmem>>, %arg7: memref<1x1x128xi32, #tpu.memory_space<vmem>>) attributes {dimension_semantics = [#tpu.dimension_semantics<parallel>, #tpu.dimension_semantics<parallel>], iteration_bounds = array<i64: 2, 2>, scalar_prefetch = 0 : i64, scratch_operands = 0 : i64, tpu.core_type = #tpu.core_type<tc>, window_params = [{transform_indices = @transform_0, window_bounds = array<i64: 1, 4, 128>}, {pipeline_mode = #tpu.pipeline_mode<synchronous>, transform_indices = @transform_1, window_bounds = array<i64: 64, 4>}, {pipeline_mode = #tpu.pipeline_mode<synchronous>, transform_indices = @transform_2, window_bounds = array<i64: 4, 64>}, {pipeline_mode = #tpu.pipeline_mode<synchronous>, transform_indices = @transform_3, window_bounds = array<i64: 64, 1>}, {transform_indices = @transform_4, window_bounds = array<i64: 1, 4, 128>}, {transform_indices = @transform_5, window_bounds = array<i64: 1, 1, 128>}]} {
    %c0 = arith.constant 0 : index
    %c0_0 = arith.constant 0 : index
    %c0_1 = arith.constant 0 : index
    %0 = vector.load %arg2[%c0, %c0_0, %c0_1] : memref<1x4x128xf32, #tpu.memory_space<vmem>>, vector<1x4x128xf32>
    %1 = vector.shape_cast %0 : vector<1x4x128xf32> to vector<4x128xf32>
    %c0_2 = arith.constant 0 : index
    %c0_3 = arith.constant 0 : index
    %2 = vector.load %arg3[%c0_2, %c0_3] : memref<64x4xf32, #tpu.memory_space<vmem>>, vector<64x4xf32>
    %c0_4 = arith.constant 0 : index
    %c0_5 = arith.constant 0 : index
    %3 = vector.load %arg4[%c0_4, %c0_5] : memref<4x64xf32, #tpu.memory_space<vmem>>, vector<4x64xf32>
    %c0_6 = arith.constant 0 : index
    %c0_7 = arith.constant 0 : index
    %4 = vector.load %arg5[%c0_6, %c0_7] : memref<64x1xf32, #tpu.memory_space<vmem>>, vector<64x1xf32>
    %cst = arith.constant dense<0.000000e+00> : vector<64x128xf32>
    %5 = tpu.matmul %2, %1, %cst {dimension_numbers = #tpu.dot_dimension_numbers<[1], [0], [0], [1], [0, 0, 1, 1], [], []>} : vector<64x4xf32>, vector<4x128xf32>, vector<64x128xf32> -> vector<64x128xf32>
    %cst_8 = arith.constant 2.000000e+00 : f32
    %6 = vector.broadcast %cst_8 : f32 to vector<64x128xf32>
    %7 = arith.mulf %6, %5 : vector<64x128xf32>
    %8 = vector.broadcast %4 : vector<64x1xf32> to vector<64x128xf32>
    %9 = arith.subf %8, %7 : vector<64x128xf32>
    %10 = tpu.iota {dimensions = array<i32: 0>} : vector<64x128xi32>
    %cst_9 = arith.constant dense<0x7F800000> : vector<128xf32>
    %11 = vector.multi_reduction <minimumf>, %9, %cst_9 [0] : vector<64x128xf32> to vector<128xf32>
    %12 = vector.shape_cast %11 : vector<128xf32> to vector<1x128xf32>
    %13 = vector.broadcast %12 : vector<1x128xf32> to vector<64x128xf32>
    %14 = arith.cmpf oeq, %9, %13 : vector<64x128xf32>
    %c64_i32 = arith.constant 64 : i32
    %15 = vector.broadcast %c64_i32 : i32 to vector<64x128xi32>
    %16 = arith.select %14, %10, %15 : vector<64x128xi1>, vector<64x128xi32>
    %cst_10 = arith.constant dense<2147483647> : vector<128xi32>
    %17 = vector.multi_reduction <minsi>, %16, %cst_10 [0] : vector<64x128xi32> to vector<128xi32>
    %18 = vector.shape_cast %17 : vector<128xi32> to vector<1x128xi32>
    %19 = vector.broadcast %18 : vector<1x128xi32> to vector<64x128xi32>
    %20 = arith.cmpi eq, %10, %19 : vector<64x128xi32>
    %21 = arith.extui %20 : vector<64x128xi1> to vector<64x128xi32>
    %22 = arith.sitofp %21 : vector<64x128xi32> to vector<64x128xf32>
    %cst_11 = arith.constant dense<0.000000e+00> : vector<4x128xf32>
    %23 = tpu.matmul %3, %22, %cst_11 {dimension_numbers = #tpu.dot_dimension_numbers<[1], [0], [0], [1], [0, 0, 1, 1], [], []>} : vector<4x64xf32>, vector<64x128xf32>, vector<4x128xf32> -> vector<4x128xf32>
    %c0_12 = arith.constant 0 : index
    %c0_13 = arith.constant 0 : index
    %c0_14 = arith.constant 0 : index
    %24 = vector.load %arg6[%c0_12, %c0_13, %c0_14] : memref<1x4x128xf32, #tpu.memory_space<vmem>>, vector<1x4x128xf32>
    %25 = vector.shape_cast %24 : vector<1x4x128xf32> to vector<4x128xf32>
    %26 = vector.shape_cast %23 : vector<4x128xf32> to vector<1x4x128xf32>
    tpu.vector_store %arg6[%c0_12, %c0_13, %c0_14], %26 {strides = array<i32>} : memref<1x4x128xf32, #tpu.memory_space<vmem>>, vector<1x4x128xf32>,
    %c0_15 = arith.constant 0 : index
    %c0_16 = arith.constant 0 : index
    %c0_17 = arith.constant 0 : index
    %27 = vector.load %arg7[%c0_15, %c0_16, %c0_17] : memref<1x1x128xi32, #tpu.memory_space<vmem>>, vector<1x1x128xi32>
    %28 = vector.shape_cast %27 : vector<1x1x128xi32> to vector<1x128xi32>
    %29 = vector.shape_cast %18 : vector<1x128xi32> to vector<1x1x128xi32>
    tpu.vector_store %arg7[%c0_15, %c0_16, %c0_17], %29 {strides = array<i32>} : memref<1x1x128xi32, #tpu.memory_space<vmem>>, vector<1x1x128xi32>,
    return
  }
  func.func @transform_0(%arg0: i32, %arg1: i32) -> (i32, i32, i32) {
    %c0_i32 = arith.constant 0 : i32
    %c0_i32_0 = arith.constant 0 : i32
    return %arg0, %c0_i32, %arg1 : i32, i32, i32
  }
  func.func @transform_1(%arg0: i32, %arg1: i32) -> (i32, i32) {
    %c0_i32 = arith.constant 0 : i32
    %c0_i32_0 = arith.constant 0 : i32
    %c0_i32_1 = arith.constant 0 : i32
    return %c0_i32, %c0_i32_0 : i32, i32
  }
  func.func @transform_2(%arg0: i32, %arg1: i32) -> (i32, i32) {
    %c0_i32 = arith.constant 0 : i32
    %c0_i32_0 = arith.constant 0 : i32
    %c0_i32_1 = arith.constant 0 : i32
    return %c0_i32, %c0_i32_0 : i32, i32
  }
  func.func @transform_3(%arg0: i32, %arg1: i32) -> (i32, i32) {
    %c0_i32 = arith.constant 0 : i32
    %c0_i32_0 = arith.constant 0 : i32
    %c0_i32_1 = arith.constant 0 : i32
    return %c0_i32, %c0_i32_0 : i32, i32
  }
  func.func @transform_4(%arg0: i32, %arg1: i32) -> (i32, i32, i32) {
    %c0_i32 = arith.constant 0 : i32
    %c0_i32_0 = arith.constant 0 : i32
    return %arg0, %c0_i32, %arg1 : i32, i32, i32
  }
  func.func @transform_5(%arg0: i32, %arg1: i32) -> (i32, i32, i32) {
    %c0_i32 = arith.constant 0 : i32
    %c0_i32_0 = arith.constant 0 : i32
    return %arg0, %c0_i32, %arg1 : i32, i32, i32
  }
}

</mosaic_0001>

<bundles_post_ra>
// kernel: vq_forward.1
= control target key start
LH: loop header
LB: loop body
LE: loop exit
PB: predicated region body
PF: predicated region fallthrough
CT: control target
= control target key end

     0   :  { %s814_s18 = smov 0   ;;  %s816_s19 = smov 0   ;;  %s950_s0 = inlined_call_operand.vmem [shape: f32[2,4,256], index: 0, kind: input, shape index: {}]   ;;  %s951_s1 = inlined_call_operand.vmem [shape: f32[64,4], index: 1, kind: input, shape index: {}]   ;;  %s952_s2 = inlined_call_operand.vmem [shape: f32[4,64], index: 2, kind: input, shape index: {}]   ;;  %s953_s3 = inlined_call_operand.vmem [shape: f32[64,1], index: 3, kind: input, shape index: {}]   ;;  %s954_s4 = inlined_call_operand.vmem [shape: f32[2,4,256], index: 4, kind: output, shape index: {0}]   ;;  %s955_s5 = inlined_call_operand.vmem [shape: s32[2,1,256], index: 5, kind: output, shape index: {1}]  }
   0x1   :  { %s818_s20 = smov 0   ;;  %s820_s21 = smov 0  }
   0x2   :  { %s822_s22 = smov 0  }
   0x3 LB: > { %s25_s23 = sadd.s32 1, %s772_s20  ;;  %s28_s24 = sadd.s32 1, %s776_s21  ;;  %s780_s22 = sphi %s822_s22, %s16_s22   ;;  %s776_s21 = sphi %s820_s21, %s959_s21   ;;  %s772_s20 = sphi %s818_s20, %s958_s20   ;;  %s768_s19 = sphi %s816_s19, %s957_s19   ;;  %s764_s18 = sphi %s814_s18, %s956_s18  }
   0x4   : > { %p26_p0 = scmp.ge.s32.totalorder %s25_s23, 2  ;;  %p661_p1 = scmp.ge.s32.totalorder %s780_s22, 1 }
   0x5   : > { %p211_p2 = scmp.lt.s32.totalorder %s780_s22, 5 }
   0x6   : > { %s961_s23 = smov (%p26_p0, %s25_s23), 0  ;;  %s963_s24 = smov (!%p26_p0, %s28_s24), %s776_s21 }
   0x7   : > { %p212_p3 = pnand %p661_p1, %p211_p2  ;;  %p30_p4 = scmp.ge.s32.totalorder %s963_s24, 2 }
   0x8   : > { %p252_p5 = scmp.lt.s32.totalorder (!%p212_p3), %s768_s19, 1  ;;  %p254_p6 = scmp.lt.s32.totalorder (!%p212_p3), %s764_s18, 1 }
   0x9   : > { %s965_s24 = smov (%p30_p4, %s963_s24), 0  ;;  %215 = sbr.rel (%p212_p3) target bundleno = 359 (0x167), region = 36 }
   0xe   : > { %v287_v0 = vld [vmem:[%s953_s3 + $0x10] sm:$0xff]  ;;  %v285_v1 = vld [vmem:[%s953_s3] sm:$0xff]  ;;  %s967_s19 = smov (!%p252_p5, %s768_s19), 1  ;;  %v782_v2 = vmov 0   ;;  %s969_s18 = smov (!%p254_p6, %s764_s18), 1  ;;  %vm318_vm0 = vcmask 1043456   ;;  %v419_v58 = vlaneseq }
   0xf   : > { %740 = vset.pattern.permute.xlu1 %v782_v2  ;;  %739 = vset.pattern.permute.xlu0 %v782_v2  ;;  %s662_s29 = sshll.u32 %s967_s19, 1  ;;  %v289_v3 = vld [vmem:[%s953_s3 + $0x20] sm:$0xff]  ;;  %vm293_vm1 = vcmask 31744   ;;  %v279_v6 = vld [vmem:[%s951_s1 + $0x18] sm:$0xff]  ;;  %v282_v7 = vld [vmem:[%s951_s1 + $0x30] sm:$0xff] }
  0x10   : > { %383 = vperm.xlu1 %740, %v287_v0   ;;  %373 = vperm.xlu0 %739, %v285_v1   ;;  %s850_s30 = sadd.s32 %s662_s29, %s969_s18  ;;  %v276_v4 = vld [vmem:[%s951_s1] sm:$0xff]  ;;  %v288_v8 = vld [vmem:[%s953_s3 + $0x18] sm:$0xff]  ;;  %v286_v9 = vld [vmem:[%s953_s3 + $0x8] sm:$0xff]  ;;  %v908_v61 = vshrl.u32 %v419_v58, 7 }
  0x11   : > { %741 = vset.pattern.permute.xlu2 %v782_v2  ;;  %s663_s8 = sshll.u32 %s850_s30, 2  ;;  %v290_v10 = vld [vmem:[%s953_s3 + $0x28] sm:$0xff]  ;;  %v280_v12 = vld [vmem:[%s951_s1 + $0x20] sm:$0xff]  ;;  %v283_v13 = vld [vmem:[%s951_s1 + $0x38] sm:$0xff]  ;;  %s274_s27 = scalar_lea.vmem %s955_s5, %s850_s30 }
  0x12   : > { %393 = vperm.xlu2 %741, %v289_v3   ;;  %s259_s11 = scalar_lea.vmem %s950_s0, %s663_s8  ;;  %v277_v11 = vld [vmem:[%s951_s1 + $0x8] sm:$0xff]  ;;  %v292_v14 = vld [vmem:[%s953_s3 + $0x38] sm:$0xff]  ;;  %v291_v15 = vld [vmem:[%s953_s3 + $0x30] sm:$0xff]  ;;  %v911_v0 = vadd.s32 8, %v908_v61  ;;  %v424_v1 = vadd.s32 32, %v908_v61  ;;  %v425_v2 = vadd.s32 40, %v908_v61  ;;  %s267_s9 = scalar_lea.vmem %s954_s4, %s663_s8 }
  0x13   : > { %v275_v5 = vld [vmem:[%s259_s11] sm:$0xf]  ;;  %v278_v16 = vld [vmem:[%s951_s1 + $0x10] sm:$0xff]  ;;  %v281_v17 = vld [vmem:[%s951_s1 + $0x28] sm:$0xff] }
  0x14   : > { %667 = vmatpush.msk.msra.mxu0 %vm318_vm0, %v275_v5  ;;  %695 = vmatpush.msk.msra.mxu2 %vm318_vm0, %v275_v5 }
  0x15   : > { %696 = vmatpush.msk.msra.mxu3 %vm318_vm0, %v275_v5  ;;  %668 = vmatmul.msk.f32.vlgmr.msra.gmra.mxu0 %vm293_vm1, %v276_v4  ;;  %v422_v4 = vadd.s32 16, %v908_v61  ;;  %v423_v5 = vadd.s32 24, %v908_v61 }
  0x16   : > { %671 = vmatmul.msk.f32.vlgmr.msra.gmra.mxu2 %vm293_vm1, %v279_v6  ;;  %674 = vmatmul.msk.f32.vlgmr.msra.gmra.mxu3 %vm293_vm1, %v282_v7  ;;  %v426_v6 = vadd.s32 48, %v908_v61  ;;  %v427_v7 = vadd.s32 56, %v908_v61 }
  0x18   : > { %388 = vperm.xlu1 %740, %v288_v8   ;;  %378 = vperm.xlu0 %739, %v286_v9  }
  0x1a   : > { %398 = vperm.xlu2 %741, %v290_v10  }
  0x1d   : > { %669 = vmatmul.msk.f32.gmra.mxu0 %vm293_vm1, %v277_v11 }
  0x1e   : > { %672 = vmatmul.msk.f32.gmra.mxu2 %vm293_vm1, %v280_v12  ;;  %675 = vmatmul.msk.f32.gmra.mxu3 %vm293_vm1, %v283_v13 }
  0x20   : > { %408 = vperm.xlu1 %740, %v292_v14   ;;  %403 = vperm.xlu0 %739, %v291_v15  }
  0x25   : > { %670 = vmatmul.msk.f32.gmra.mxu0 %vm293_vm1, %v278_v16 }
  0x26   : > { %673 = vmatmul.msk.f32.gmra.mxu2 %vm293_vm1, %v281_v17 }
  0x6c   : > { %v394_v26 = vpop.permute.xlu2 %393 }
  0x74   : > { %v399_v46 = vpop.permute.xlu2 %398 }
  0x82   : > { %v374_v19 = vpop.permute.xlu0 %373  ;;  %v384_v20 = vpop.permute.xlu1 %383 }
  0x8a   : > { %v379_v24 = vpop.permute.xlu0 %378  ;;  %v389_v25 = vpop.permute.xlu1 %388 }
  0x92   : > { %v339_v18 = vpop.f32.mrf.mxu0  ;;  %v404_v35 = vpop.permute.xlu0 %403 }
  0x93   : > { %v363_v34 = vmul.f32 2.0, %v339_v18  ;;  %v409_v39 = vpop.permute.xlu1 %408 }
  0x95   : > { %v411_v45 = vsub.f32 %v374_v19, %v363_v34 }
  0x99   : > { %v348_v21 = vpop.f32.mrf.mxu2  ;;  %v357_v22 = vpop.f32.mrf.mxu3 }
  0x9a   : > { %v342_v23 = vpop.f32.mrf.mxu0  ;;  %v369_v31 = vmul.f32 2.0, %v357_v22  ;;  %v366_v36 = vmul.f32 2.0, %v348_v21 }
  0x9b   : > { %v364_v37 = vmul.f32 2.0, %v342_v23 }
  0x9c   : > { %v417_v41 = vsub.f32 %v404_v35, %v369_v31  ;;  %v414_v47 = vsub.f32 %v389_v25, %v366_v36 }
  0x9d   : > { %v412_v48 = vsub.f32 %v379_v24, %v364_v37 }
  0xa1   : > { %v351_v27 = vpop.f32.mrf.mxu2  ;;  %v360_v29 = vpop.f32.mrf.mxu3 }
  0xa2   : > { %v345_v28 = vpop.f32.mrf.mxu0  ;;  %v367_v32 = vmul.f32 2.0, %v351_v27  ;;  %v370_v33 = vmul.f32 2.0, %v360_v29  ;;  %v783_v29 = vmov 1.0  }
  0xa3   : > { %v365_v30 = vmul.f32 2.0, %v345_v28 }
  0xa4   : > { %v415_v42 = vsub.f32 %v394_v26, %v367_v32  ;;  %v418_v43 = vsub.f32 %v409_v39, %v370_v33 }
  0xa5   : > { %v413_v38 = vsub.f32 %v384_v20, %v365_v30  ;;  %v284_v30 = vld [vmem:[%s952_s2] sm:$0xf] }
  0xa6   : > { %v428_v51 = vmin.f32 %v411_v45, %v415_v42  ;;  %v431_v52 = vmin.f32 %v414_v47, %v418_v43 }
  0xa7   : > { %v430_v49 = vmin.f32 %v413_v38, %v417_v41 }
  0xa9   : > { %v354_v40 = vpop.f32.mrf.mxu2  ;;  %v433_v54 = vmin.f32 %v430_v49, %v431_v52 }
  0xaa   : > { %v368_v44 = vmul.f32 2.0, %v354_v40 }
  0xac   : > { %v416_v50 = vsub.f32 %v399_v46, %v368_v44 }
  0xae   : > { %v429_v53 = vmin.f32 %v412_v48, %v416_v50 }
  0xb0   : > { %v432_v55 = vmin.f32 %v428_v51, %v429_v53 }
  0xb2   : > { %v434_v56 = vmin.f32 %v432_v55, %v433_v54 }
  0xb4   : > { %v435_v57 = vrot.slane %v434_v56, 4 }
  0xb6   : > { %v436_v59 = vmin.f32 %v434_v56, %v435_v57 }
  0xb8   : > { %v437_v60 = vrot.slane %v436_v59, 2 }
  0xba   : > { %v438_v62 = vmin.f32 %v436_v59, %v437_v60 }
  0xbc   : > { %v439_v63 = vrot.slane %v438_v62, 1 }
  0xbe   : > { %v440_v3 = vmin.f32 %v438_v62, %v439_v63 }
  0xc0   : > { %vm441_vm2 = vcmp.eq.f32.partialorder %v411_v45, %v440_v3  ;;  %vm442_vm3 = vcmp.eq.f32.partialorder %v412_v48, %v440_v3  ;;  %vm445_vm4 = vcmp.eq.f32.partialorder %v415_v42, %v440_v3  ;;  %vm446_vm5 = vcmp.eq.f32.partialorder %v416_v50, %v440_v3 }
  0xc1   : > { %v449_v8 = vsel %vm441_vm2, %v908_v61, 64  ;;  %v450_v9 = vsel %vm442_vm3, %v911_v0, 64  ;;  %v453_v10 = vsel %vm445_vm4, %v424_v1, 64  ;;  %v454_v11 = vsel %vm446_vm5, %v425_v2, 64 }
  0xc2   : > { %vm457_vm6 = vcmp.lt.s32.totalorder %v449_v8, %v453_v10  ;;  %vm459_vm7 = vcmp.lt.s32.totalorder %v450_v9, %v454_v11  ;;  %vm443_vm8 = vcmp.eq.f32.partialorder %v413_v38, %v440_v3  ;;  %vm444_vm9 = vcmp.eq.f32.partialorder %v414_v47, %v440_v3 }
  0xc3   : > { %v458_v12 = vsel %vm457_vm6, %v449_v8, %v453_v10  ;;  %v460_v13 = vsel %vm459_vm7, %v450_v9, %v454_v11  ;;  %vm447_vm10 = vcmp.eq.f32.partialorder %v417_v41, %v440_v3  ;;  %vm448_vm11 = vcmp.eq.f32.partialorder %v418_v43, %v440_v3 }
  0xc4   : > { %vm465_vm12 = vcmp.lt.s32.totalorder %v458_v12, %v460_v13  ;;  %v451_v14 = vsel %vm443_vm8, %v422_v4, 64  ;;  %v452_v15 = vsel %vm444_vm9, %v423_v5, 64  ;;  %v455_v16 = vsel %vm447_vm10, %v426_v6, 64 }
  0xc5   : > { %v456_v17 = vsel %vm448_vm11, %v427_v7, 64  ;;  %vm461_vm13 = vcmp.lt.s32.totalorder %v451_v14, %v455_v16  ;;  %v466_v19 = vsel %vm465_vm12, %v458_v12, %v460_v13  ;;  %vm504_vm11 = vcmask 523264  }
  0xc6   : > { %v462_v18 = vsel %vm461_vm13, %v451_v14, %v455_v16  ;;  %vm463_vm14 = vcmp.lt.s32.totalorder %v452_v15, %v456_v17 }
  0xc7   : > { %v464_v20 = vsel %vm463_vm14, %v452_v15, %v456_v17 }
  0xc8   : > { %vm467_vm15 = vcmp.lt.s32.totalorder %v462_v18, %v464_v20 }
  0xc9   : > { %v468_v21 = vsel %vm467_vm15, %v462_v18, %v464_v20 }
  0xca   : > { %vm469_vm0 = vcmp.lt.s32.totalorder %v466_v19, %v468_v21 }
  0xcb   : > { %v470_v22 = vsel %vm469_vm0, %v466_v19, %v468_v21 }
  0xcc   : > { %v471_v23 = vrot.slane %v470_v22, 4 }
  0xce   : > { %vm472_vm1 = vcmp.lt.s32.totalorder %v470_v22, %v471_v23 }
  0xcf   : > { %v473_v24 = vsel %vm472_vm1, %v470_v22, %v471_v23 }
  0xd0   : > { %v474_v25 = vrot.slane %v473_v24, 2 }
  0xd2   : > { %vm475_vm2 = vcmp.lt.s32.totalorder %v473_v24, %v474_v25 }
  0xd3   : > { %v476_v26 = vsel %vm475_vm2, %v473_v24, %v474_v25 }
  0xd4   : > { %v477_v27 = vrot.slane %v476_v26, 1 }
  0xd6   : > { %vm478_vm3 = vcmp.lt.s32.totalorder %v476_v26, %v477_v27 }
  0xd7   : > { %v479_v28 = vsel %vm478_vm3, %v476_v26, %v477_v27 }
  0xd8   : > { %vm487_vm4 = vcmp.eq.s32.totalorder %v427_v7, %v479_v28  ;;  %529 = vst [vmem:[%s274_s27] sm:$0x1] %v479_v28  ;;  %vm486_vm5 = vcmp.eq.s32.totalorder %v426_v6, %v479_v28  ;;  %vm485_vm6 = vcmp.eq.s32.totalorder %v425_v2, %v479_v28  ;;  %vm484_vm7 = vcmp.eq.s32.totalorder %v424_v1, %v479_v28 }
  0xd9   : > { %684 = vmatpush.msk.msra.mxu1 %vm487_vm4, %v783_v29  ;;  %vm483_vm8 = vcmp.eq.s32.totalorder %v423_v5, %v479_v28  ;;  %vm482_vm9 = vcmp.eq.s32.totalorder %v422_v4, %v479_v28  ;;  %vm481_vm10 = vcmp.eq.s32.totalorder %v911_v0, %v479_v28  ;;  %vm480_vm12 = vcmp.eq.s32.totalorder %v908_v61, %v479_v28 }
  0xdb   : > { %685 = vmatpush.msk.msra.mxu1 %vm486_vm5, %v783_v29 }
  0xdd   : > { %686 = vmatpush.msk.msra.mxu1 %vm485_vm6, %v783_v29 }
  0xdf   : > { %687 = vmatpush.msk.msra.mxu1 %vm484_vm7, %v783_v29 }
  0xe1   : > { %688 = vmatpush.msk.msra.mxu1 %vm483_vm8, %v783_v29 }
  0xe3   : > { %689 = vmatpush.msk.msra.mxu1 %vm482_vm9, %v783_v29 }
  0xe5   : > { %690 = vmatpush.msk.msra.mxu1 %vm481_vm10, %v783_v29 }
  0xe7   : > { %691 = vmatpush.msk.msra.mxu1 %vm480_vm12, %v783_v29 }
  0xe8   : > { %692 = vmatmul.msk.f32.vlgmr.msra.gmra.mxu1 %vm504_vm11, %v284_v30 }
 0x165   : > { %v525_v31 = vpop.f32.mrf.mxu1 }
 0x166   : > { %528 = vst [vmem:[%s267_s9] sm:$0xf] %v525_v31 }
 0x167 PF: > { %s16_s22 = sadd.s32 1, %s780_s22   ;;  %s956_s18 = smov %s772_s20 }
 0x168   : > { %p13_p7 = scmp.ge.s32.totalorder %s16_s22, 6   ;;  %s957_s19 = smov %s776_s21 }
 0x169   : > { %s958_s20 = smov %s961_s23  ;;  %s959_s21 = smov %s965_s24 }
 0x16a   :  { %15 = sbr.rel (!%p13_p7) target bundleno = 3 (0x3), region = 78 }

</bundles_post_ra>
